<compile_context>
chip_gen: v7x
topology: tpu7x:2x2x1
jax: 0.10.0
libtpu: 0.0.40
codegen_flags: <defaults>
</compile_context>

<pallas_src>
import functools

import jax
import jax.numpy as jnp
from jax import lax
from jax.experimental import pallas as pl
from jax.experimental.pallas import tpu as pltpu


def _round_up(x, m):
    return (x + m - 1) // m * m


# --------------------------------------------------------------------------- #
# One-shot projected-embedding-table kernel:
#   proj_table = emb_table @ W_ih^T + (b_ih + b_hh)      (vocab, H)
# vocab is tiny, so this runs once and removes the per-token input projection.
# --------------------------------------------------------------------------- #
def _proj_table_kernel(emb_ref, wih_ref, b_ref, out_ref):
    out_ref[...] = (
        jnp.dot(emb_ref[...], wih_ref[...], preferred_element_type=jnp.float32)
        + b_ref[...]
    )


def _make_proj_table(emb_bf16, wih_t_bf16, b_f32):
    V, E = emb_bf16.shape
    H = wih_t_bf16.shape[1]
    return pl.pallas_call(
        _proj_table_kernel,
        out_shape=jax.ShapeDtypeStruct((V, H), jnp.float32),
        grid_spec=pltpu.PrefetchScalarGridSpec(
            num_scalar_prefetch=0,
            grid=(1,),
            in_specs=[
                pl.BlockSpec((V, E), lambda i: (0, 0)),
                pl.BlockSpec((E, H), lambda i: (0, 0)),
                pl.BlockSpec((1, H), lambda i: (0, 0)),
            ],
            out_specs=pl.BlockSpec((V, H), lambda i: (0, 0)),
        ),
        compiler_params=pltpu.CompilerParams(
            dimension_semantics=("arbitrary",)),
    )(emb_bf16, wih_t_bf16, b_f32)


# --------------------------------------------------------------------------- #
# Fused tanh recurrence + output projection, streamed over (batch, time) tiles.
# --------------------------------------------------------------------------- #
def _rnn_fused_kernel(xproj_ref, whh_ref, wfc_ref, bfc_ref, out_ref,
                      h_ref, hbuf_ref):
    """One (batch-tile, time-chunk) grid step.

    xproj_ref : (tt, Bt, H)   f32   pre-projected inputs x_t@W_ih^T + bias
    whh_ref   : (H, H)        bf16  hidden->hidden weight (transposed)
    wfc_ref   : (H, KPAD)     bf16  output weight (transposed, lane-padded)
    bfc_ref   : (1, KPAD)     f32
    out_ref   : (tt, Bt, KPAD) f32  logits for this chunk (time-major)
    h_ref     : (Bt, H)       f32   scratch; hidden carry across time chunks
    hbuf_ref  : (tt, Bt, H)   f32   scratch; this chunk's hidden states
    """
    tt, Bt, H = xproj_ref.shape
    KPAD = out_ref.shape[2]

    # New batch tile -> reset the hidden-state carry (h0 = 0).
    @pl.when(pl.program_id(1) == 0)
    def _():
        h_ref[...] = jnp.zeros_like(h_ref)

    # Loop-invariant weights hoisted out of the serial loop.  (Relies on the
    # compiler keeping W_hh staged across the unrolled iterations; explicit
    # pltpu.matmul_push_rhs would be the next step if the bundle dump showed
    # re-pushes.)
    whh = whh_ref[...]

    def step(t, h):
        # Only h @ W_hh sits on the serial chain; xproj is a plain vreg load.
        pre = xproj_ref[t] + jnp.dot(h.astype(jnp.bfloat16), whh,
                                     preferred_element_type=jnp.float32)
        h_new = jnp.tanh(pre)                      # f32 carry, f32 tanh
        hbuf_ref[t] = h_new
        return h_new

    # Bounded unroll: only within this time chunk (tt is small), so LLO keeps
    # scheduling visibility without instruction-count blowup for long T.
    h_final = lax.fori_loop(0, tt, step, h_ref[...], unroll=True)
    h_ref[...] = h_final

    # Fused output projection for the whole chunk (off the serial chain,
    # lane-dense KPAD -> unmasked stores).  Hidden states never reach HBM.
    hs = hbuf_ref[...].reshape(tt * Bt, H).astype(jnp.bfloat16)
    logits = (jnp.dot(hs, wfc_ref[...], preferred_element_type=jnp.float32)
              + bfc_ref[...])
    out_ref[...] = logits.reshape(tt, Bt, KPAD)


def _rnn_fused(xproj_tm, whh_bf16, wfc_pad_bf16, bfc_pad, *, b_tile, t_tile):
    T_pad, B_pad, H = xproj_tm.shape
    KPAD = wfc_pad_bf16.shape[1]
    nb = B_pad // b_tile
    nt = T_pad // t_tile
    return pl.pallas_call(
        _rnn_fused_kernel,
        out_shape=jax.ShapeDtypeStruct((T_pad, B_pad, KPAD), jnp.float32),
        grid_spec=pltpu.PrefetchScalarGridSpec(
            num_scalar_prefetch=0,
            grid=(nb, nt),
            in_specs=[
                pl.BlockSpec((t_tile, b_tile, H), lambda b, t: (t, b, 0)),
                pl.BlockSpec((H, H), lambda b, t: (0, 0)),
                pl.BlockSpec((H, KPAD), lambda b, t: (0, 0)),
                pl.BlockSpec((1, KPAD), lambda b, t: (0, 0)),
            ],
            out_specs=pl.BlockSpec((t_tile, b_tile, KPAD),
                                   lambda b, t: (t, b, 0)),
            scratch_shapes=[
                pltpu.VMEM((b_tile, H), jnp.float32),           # hidden carry
                pltpu.VMEM((t_tile, b_tile, H), jnp.float32),   # chunk hiddens
            ],
        ),
        compiler_params=pltpu.CompilerParams(
            # Batch tiles are independent recurrences (v7x megacore can shard
            # them); time chunks are inherently serial.
            dimension_semantics=("parallel", "arbitrary"),
        ),
    )(xproj_tm, whh_bf16, wfc_pad_bf16, bfc_pad)


# --------------------------------------------------------------------------- #
# Forward pass matching torch: Embedding -> nn.RNN(tanh, batch_first) -> Linear
# --------------------------------------------------------------------------- #
@functools.partial(jax.jit, static_argnames=("b_tile", "t_tile"))
def rnn_ner_forward(x, emb_table, w_ih, w_hh, b_ih, b_hh, w_fc, b_fc,
                    *, b_tile=8, t_tile=8):
    """x: (B, T) int32 token ids; returns (B, T, K) float32 logits."""
    B, T = x.shape
    H = w_hh.shape[0]
    K = w_fc.shape[0]
    KPAD = _round_up(K, 128)            # lane-dense logits width
    B_pad = _round_up(B, b_tile)        # full f32 sublanes per batch tile
    T_pad = _round_up(T, t_tile)        # whole time chunks

    # ---- one-time weight prep (bf16 MXU operands, f32 accumulation) ----
    b_rnn = (b_ih + b_hh).reshape(1, H).astype(jnp.float32)
    proj_table = _make_proj_table(emb_table.astype(jnp.bfloat16),
                                  w_ih.T.astype(jnp.bfloat16),
                                  b_rnn)                         # (V, H) f32
    whh_bf16 = w_hh.T.astype(jnp.bfloat16)                        # (H, H)
    wfc_pad = jnp.zeros((H, KPAD), jnp.bfloat16).at[:, :K].set(
        w_fc.T.astype(jnp.bfloat16))                              # (H, KPAD)
    bfc_pad = jnp.zeros((1, KPAD), jnp.float32).at[:, :K].set(b_fc[None, :])

    # ---- glue: pad ids and gather pre-projected rows, time-major ----
    # TODO(synk): the data-dependent row gather stays as plain-JAX jnp.take
    # glue (a scalar-prefetch DMA-gather kernel would be the Pallas-native
    # alternative).
    x_pad = jnp.zeros((B_pad, T_pad), x.dtype).at[:B, :T].set(x)
    xproj_tm = jnp.take(proj_table, x_pad.T, axis=0)   # (T_pad, B_pad, H) f32

    # ---- fused streamed recurrence + output projection ----
    logits_tm = _rnn_fused(xproj_tm, whh_bf16, wfc_pad, bfc_pad,
                           b_tile=b_tile, t_tile=t_tile)  # (T_pad,B_pad,KPAD)

    # Layout glue back to module convention (batch-major, true K).
    return jnp.transpose(logits_tm, (1, 0, 2))[:B, :T, :K]


# --------------------------------------------------------------------------- #
# References for verification.
# --------------------------------------------------------------------------- #
def _reference_forward_mixed(x, emb_table, w_ih, w_hh, b_ih, b_hh, w_fc, b_fc):
    """Pure-JAX reference mirroring the kernels' bf16-operand / f32-accumulate
    arithmetic (tight tolerance check)."""
    b_rnn = (b_ih + b_hh).astype(jnp.float32)
    proj_table = jnp.dot(emb_table.astype(jnp.bfloat16),
                         w_ih.T.astype(jnp.bfloat16),
                         preferred_element_type=jnp.float32) + b_rnn
    xproj = jnp.take(proj_table, x, axis=0)                     # (B, T, H) f32
    whh = w_hh.T.astype(jnp.bfloat16)
    wfc = w_fc.T.astype(jnp.bfloat16)
    B = x.shape[0]
    H = w_hh.shape[0]

    def step(h, xp_t):
        h_new = jnp.tanh(xp_t + jnp.dot(h.astype(jnp.bfloat16), whh,
                                        preferred_element_type=jnp.float32))
        return h_new, h_new

    h0 = jnp.zeros((B, H), jnp.float32)
    _, hs = lax.scan(step, h0, jnp.transpose(xproj, (1, 0, 2)))  # (T, B, H)
    out = jnp.transpose(hs, (1, 0, 2))                           # (B, T, H)
    return (jnp.dot(out.astype(jnp.bfloat16), wfc,
                    preferred_element_type=jnp.float32) + b_fc)


def _reference_forward_f32(x, emb_table, w_ih, w_hh, b_ih, b_hh, w_fc, b_fc):
    """Full-f32 reference mirroring torch semantics (loose tolerance check)."""
    hp = lax.Precision.HIGHEST
    emb = jnp.take(emb_table, x, axis=0)                         # (B, T, E)
    B = x.shape[0]
    H = w_hh.shape[0]

    def step(h, x_t):
        h_new = jnp.tanh(jnp.dot(x_t, w_ih.T, precision=hp)
                         + jnp.dot(h, w_hh.T, precision=hp)
                         + b_ih + b_hh)
        return h_new, h_new

    h0 = jnp.zeros((B, H), jnp.float32)
    _, hs = lax.scan(step, h0, jnp.transpose(emb, (1, 0, 2)))    # (T, B, H)
    out = jnp.transpose(hs, (1, 0, 2))                           # (B, T, H)
    return jnp.dot(out, w_fc.T, precision=hp) + b_fc


if __name__ == "__main__":
    # Small, module-consistent shapes.
    vocab_size = 50
    tagset_size = 10
    embedding_dim = 64
    hidden_dim = 128
    B, T = 2, 8

    key = jax.random.PRNGKey(0)
    k_emb, k_wih, k_whh, k_bih, k_bhh, k_wfc, k_bfc, k_x = jax.random.split(key, 8)

    # Deterministic parameter init (roughly PyTorch-style uniform ranges).
    emb_table = 0.1 * jax.random.normal(k_emb, (vocab_size, embedding_dim),
                                        dtype=jnp.float32)
    emb_table = emb_table.at[0].set(0.0)          # padding_idx=0

    s_rnn = 1.0 / jnp.sqrt(hidden_dim)
    w_ih = jax.random.uniform(k_wih, (hidden_dim, embedding_dim),
                              minval=-s_rnn, maxval=s_rnn, dtype=jnp.float32)
    w_hh = jax.random.uniform(k_whh, (hidden_dim, hidden_dim),
                              minval=-s_rnn, maxval=s_rnn, dtype=jnp.float32)
    b_ih = jax.random.uniform(k_bih, (hidden_dim,),
                              minval=-s_rnn, maxval=s_rnn, dtype=jnp.float32)
    b_hh = jax.random.uniform(k_bhh, (hidden_dim,),
                              minval=-s_rnn, maxval=s_rnn, dtype=jnp.float32)

    s_fc = 1.0 / jnp.sqrt(hidden_dim)
    w_fc = jax.random.uniform(k_wfc, (tagset_size, hidden_dim),
                              minval=-s_fc, maxval=s_fc, dtype=jnp.float32)
    b_fc = jax.random.uniform(k_bfc, (tagset_size,),
                              minval=-s_fc, maxval=s_fc, dtype=jnp.float32)

    # Token ids (include some padding zeros).
    x = jax.random.randint(k_x, (B, T), 0, vocab_size, dtype=jnp.int32)

    logits = rnn_ner_forward(x, emb_table, w_ih, w_hh, b_ih, b_hh, w_fc, b_fc)
    logits = jax.block_until_ready(logits)
    assert logits.shape == (B, T, tagset_size)

    ref_mixed = _reference_forward_mixed(x, emb_table, w_ih, w_hh,
                                         b_ih, b_hh, w_fc, b_fc)
    assert jnp.allclose(logits, ref_mixed, atol=2e-3, rtol=2e-3), \
        "mismatch vs mixed-precision reference"

    ref_f32 = _reference_forward_f32(x, emb_table, w_ih, w_hh,
                                     b_ih, b_hh, w_fc, b_fc)
    assert jnp.allclose(logits, ref_f32, atol=2e-2, rtol=2e-2), \
        "mismatch vs f32 reference"

    print("KERNEL_OK")
</pallas_src>

<mosaic_0001>
module attributes {stable_mosaic.version = 11 : i64} {
  func.func @_proj_table_kernel(%arg0: i32, %arg1: memref<50x64xbf16, #tpu.memory_space<vmem>>, %arg2: memref<64x128xbf16, #tpu.memory_space<vmem>>, %arg3: memref<1x128xf32, #tpu.memory_space<vmem>>, %arg4: memref<50x128xf32, #tpu.memory_space<vmem>>) attributes {dimension_semantics = [#tpu.dimension_semantics<arbitrary>], iteration_bounds = array<i64: 1>, scalar_prefetch = 0 : i64, scratch_operands = 0 : i64, tpu.core_type = #tpu.core_type<tc>, window_params = [{pipeline_mode = #tpu.pipeline_mode<synchronous>, transform_indices = @transform_0, window_bounds = array<i64: 50, 64>}, {pipeline_mode = #tpu.pipeline_mode<synchronous>, transform_indices = @transform_1, window_bounds = array<i64: 64, 128>}, {pipeline_mode = #tpu.pipeline_mode<synchronous>, transform_indices = @transform_2, window_bounds = array<i64: 1, 128>}, {pipeline_mode = #tpu.pipeline_mode<synchronous>, transform_indices = @transform_3, window_bounds = array<i64: 50, 128>}]} {
    %c0 = arith.constant 0 : index
    %c0_0 = arith.constant 0 : index
    %0 = vector.load %arg1[%c0, %c0_0] : memref<50x64xbf16, #tpu.memory_space<vmem>>, vector<50x64xbf16>
    %c0_1 = arith.constant 0 : index
    %c0_2 = arith.constant 0 : index
    %1 = vector.load %arg2[%c0_1, %c0_2] : memref<64x128xbf16, #tpu.memory_space<vmem>>, vector<64x128xbf16>
    %cst = arith.constant dense<0.000000e+00> : vector<50x128xf32>
    %2 = tpu.matmul %0, %1, %cst {dimension_numbers = #tpu.dot_dimension_numbers<[1], [0], [0], [1], [0, 0, 1, 1], [], []>} : vector<50x64xbf16>, vector<64x128xbf16>, vector<50x128xf32> -> vector<50x128xf32>
    %c0_3 = arith.constant 0 : index
    %c0_4 = arith.constant 0 : index
    %3 = vector.load %arg3[%c0_3, %c0_4] : memref<1x128xf32, #tpu.memory_space<vmem>>, vector<1x128xf32>
    %4 = vector.broadcast %3 : vector<1x128xf32> to vector<50x128xf32>
    %5 = arith.addf %2, %4 : vector<50x128xf32>
    %c0_5 = arith.constant 0 : index
    %c0_6 = arith.constant 0 : index
    %6 = vector.load %arg4[%c0_5, %c0_6] : memref<50x128xf32, #tpu.memory_space<vmem>>, vector<50x128xf32>
    tpu.vector_store %arg4[%c0_5, %c0_6], %5 {strides = array<i32>} : memref<50x128xf32, #tpu.memory_space<vmem>>, vector<50x128xf32>,
    return
  }
  func.func @transform_0(%arg0: i32) -> (i32, i32) {
    %c0_i32 = arith.constant 0 : i32
    %c0_i32_0 = arith.constant 0 : i32
    %c0_i32_1 = arith.constant 0 : i32
    return %c0_i32, %c0_i32_0 : i32, i32
  }
  func.func @transform_1(%arg0: i32) -> (i32, i32) {
    %c0_i32 = arith.constant 0 : i32
    %c0_i32_0 = arith.constant 0 : i32
    %c0_i32_1 = arith.constant 0 : i32
    return %c0_i32, %c0_i32_0 : i32, i32
  }
  func.func @transform_2(%arg0: i32) -> (i32, i32) {
    %c0_i32 = arith.constant 0 : i32
    %c0_i32_0 = arith.constant 0 : i32
    %c0_i32_1 = arith.constant 0 : i32
    return %c0_i32, %c0_i32_0 : i32, i32
  }
  func.func @transform_3(%arg0: i32) -> (i32, i32) {
    %c0_i32 = arith.constant 0 : i32
    %c0_i32_0 = arith.constant 0 : i32
    %c0_i32_1 = arith.constant 0 : i32
    return %c0_i32, %c0_i32_0 : i32, i32
  }
}

module attributes {stable_mosaic.version = 11 : i64} {
  func.func @_rnn_fused_kernel(%arg0: i32, %arg1: i32, %arg2: memref<8x8x128xf32, #tpu.memory_space<vmem>>, %arg3: memref<128x128xbf16, #tpu.memory_space<vmem>>, %arg4: memref<128x128xbf16, #tpu.memory_space<vmem>>, %arg5: memref<1x128xf32, #tpu.memory_space<vmem>>, %arg6: memref<8x8x128xf32, #tpu.memory_space<vmem>>, %arg7: memref<8x128xf32, #tpu.memory_space<vmem>>, %arg8: memref<8x8x128xf32, #tpu.memory_space<vmem>>) attributes {dimension_semantics = [#tpu.dimension_semantics<parallel>, #tpu.dimension_semantics<arbitrary>], iteration_bounds = array<i64: 1, 1>, scalar_prefetch = 0 : i64, scratch_operands = 2 : i64, tpu.core_type = #tpu.core_type<tc>, window_params = [{transform_indices = @transform_0, window_bounds = array<i64: 8, 8, 128>}, {pipeline_mode = #tpu.pipeline_mode<synchronous>, transform_indices = @transform_1, window_bounds = array<i64: 128, 128>}, {pipeline_mode = #tpu.pipeline_mode<synchronous>, transform_indices = @transform_2, window_bounds = array<i64: 128, 128>}, {pipeline_mode = #tpu.pipeline_mode<synchronous>, transform_indices = @transform_3, window_bounds = array<i64: 1, 128>}, {transform_indices = @transform_4, window_bounds = array<i64: 8, 8, 128>}]} {
    %c0_i32 = arith.constant 0 : i32
    %0 = arith.cmpi eq, %arg1, %c0_i32 : i32
    %1 = arith.extui %0 : i1 to i32
    %c0_i32_0 = arith.constant 0 : i32
    %2 = arith.cmpi ne, %1, %c0_i32_0 : i32
    scf.if %2 {
      %cst_57 = arith.constant 0.000000e+00 : f32
      %104 = vector.broadcast %cst_57 : f32 to vector<8x128xf32>
      %c0_58 = arith.constant 0 : index
      %c0_59 = arith.constant 0 : index
      %105 = vector.load %arg7[%c0_58, %c0_59] : memref<8x128xf32, #tpu.memory_space<vmem>>, vector<8x128xf32>
      tpu.vector_store %arg7[%c0_58, %c0_59], %104 {strides = array<i32>} : memref<8x128xf32, #tpu.memory_space<vmem>>, vector<8x128xf32>,
    } else {
    }
    %c0 = arith.constant 0 : index
    %c0_1 = arith.constant 0 : index
    %3 = vector.load %arg3[%c0, %c0_1] : memref<128x128xbf16, #tpu.memory_space<vmem>>, vector<128x128xbf16>
    %c0_2 = arith.constant 0 : index
    %c0_3 = arith.constant 0 : index
    %4 = vector.load %arg7[%c0_2, %c0_3] : memref<8x128xf32, #tpu.memory_space<vmem>>, vector<8x128xf32>
    %c0_i32_4 = arith.constant 0 : i32
    %5 = arith.index_cast %c0_i32_4 : i32 to index
    %c0_5 = arith.constant 0 : index
    %c0_6 = arith.constant 0 : index
    %6 = vector.load %arg2[%5, %c0_5, %c0_6] : memref<8x8x128xf32, #tpu.memory_space<vmem>>, vector<1x8x128xf32>
    %7 = vector.shape_cast %6 : vector<1x8x128xf32> to vector<8x128xf32>
    %8 = arith.truncf %4 : vector<8x128xf32> to vector<8x128xbf16>
    %cst = arith.constant dense<0.000000e+00> : vector<8x128xf32>
    %9 = tpu.matmul %8, %3, %cst {dimension_numbers = #tpu.dot_dimension_numbers<[1], [0], [0], [1], [0, 0, 1, 1], [], []>} : vector<8x128xbf16>, vector<128x128xbf16>, vector<8x128xf32> -> vector<8x128xf32>
    %10 = arith.addf %7, %9 : vector<8x128xf32>
    %11 = math.tanh %10 : vector<8x128xf32>
    %12 = arith.index_cast %c0_i32_4 : i32 to index
    %c0_7 = arith.constant 0 : index
    %c0_8 = arith.constant 0 : index
    %13 = vector.load %arg8[%12, %c0_7, %c0_8] : memref<8x8x128xf32, #tpu.memory_space<vmem>>, vector<1x8x128xf32>
    %14 = vector.shape_cast %13 : vector<1x8x128xf32> to vector<8x128xf32>
    %15 = vector.shape_cast %11 : vector<8x128xf32> to vector<1x8x128xf32>
    tpu.vector_store %arg8[%12, %c0_7, %c0_8], %15 {strides = array<i32>} : memref<8x8x128xf32, #tpu.memory_space<vmem>>, vector<1x8x128xf32>,
    %c1_i32 = arith.constant 1 : i32
    %16 = arith.index_cast %c1_i32 : i32 to index
    %c0_9 = arith.constant 0 : index
    %c0_10 = arith.constant 0 : index
    %17 = vector.load %arg2[%16, %c0_9, %c0_10] : memref<8x8x128xf32, #tpu.memory_space<vmem>>, vector<1x8x128xf32>
    %18 = vector.shape_cast %17 : vector<1x8x128xf32> to vector<8x128xf32>
    %19 = arith.truncf %11 : vector<8x128xf32> to vector<8x128xbf16>
    %cst_11 = arith.constant dense<0.000000e+00> : vector<8x128xf32>
    %20 = tpu.matmul %19, %3, %cst_11 {dimension_numbers = #tpu.dot_dimension_numbers<[1], [0], [0], [1], [0, 0, 1, 1], [], []>} : vector<8x128xbf16>, vector<128x128xbf16>, vector<8x128xf32> -> vector<8x128xf32>
    %21 = arith.addf %18, %20 : vector<8x128xf32>
    %22 = math.tanh %21 : vector<8x128xf32>
    %23 = arith.index_cast %c1_i32 : i32 to index
    %c0_12 = arith.constant 0 : index
    %c0_13 = arith.constant 0 : index
    %24 = vector.load %arg8[%23, %c0_12, %c0_13] : memref<8x8x128xf32, #tpu.memory_space<vmem>>, vector<1x8x128xf32>
    %25 = vector.shape_cast %24 : vector<1x8x128xf32> to vector<8x128xf32>
    %26 = vector.shape_cast %22 : vector<8x128xf32> to vector<1x8x128xf32>
    tpu.vector_store %arg8[%23, %c0_12, %c0_13], %26 {strides = array<i32>} : memref<8x8x128xf32, #tpu.memory_space<vmem>>, vector<1x8x128xf32>,
    %c2_i32 = arith.constant 2 : i32
    %27 = arith.index_cast %c2_i32 : i32 to index
    %c0_14 = arith.constant 0 : index
    %c0_15 = arith.constant 0 : index
    %28 = vector.load %arg2[%27, %c0_14, %c0_15] : memref<8x8x128xf32, #tpu.memory_space<vmem>>, vector<1x8x128xf32>
    %29 = vector.shape_cast %28 : vector<1x8x128xf32> to vector<8x128xf32>
    %30 = arith.truncf %22 : vector<8x128xf32> to vector<8x128xbf16>
    %cst_16 = arith.constant dense<0.000000e+00> : vector<8x128xf32>
    %31 = tpu.matmul %30, %3, %cst_16 {dimension_numbers = #tpu.dot_dimension_numbers<[1], [0], [0], [1], [0, 0, 1, 1], [], []>} : vector<8x128xbf16>, vector<128x128xbf16>, vector<8x128xf32> -> vector<8x128xf32>
    %32 = arith.addf %29, %31 : vector<8x128xf32>
    %33 = math.tanh %32 : vector<8x128xf32>
    %34 = arith.index_cast %c2_i32 : i32 to index
    %c0_17 = arith.constant 0 : index
    %c0_18 = arith.constant 0 : index
    %35 = vector.load %arg8[%34, %c0_17, %c0_18] : memref<8x8x128xf32, #tpu.memory_space<vmem>>, vector<1x8x128xf32>
    %36 = vector.shape_cast %35 : vector<1x8x128xf32> to vector<8x128xf32>
    %37 = vector.shape_cast %33 : vector<8x128xf32> to vector<1x8x128xf32>
    tpu.vector_store %arg8[%34, %c0_17, %c0_18], %37 {strides = array<i32>} : memref<8x8x128xf32, #tpu.memory_space<vmem>>, vector<1x8x128xf32>,
    %c3_i32 = arith.constant 3 : i32
    %38 = arith.index_cast %c3_i32 : i32 to index
    %c0_19 = arith.constant 0 : index
    %c0_20 = arith.constant 0 : index
    %39 = vector.load %arg2[%38, %c0_19, %c0_20] : memref<8x8x128xf32, #tpu.memory_space<vmem>>, vector<1x8x128xf32>
    %40 = vector.shape_cast %39 : vector<1x8x128xf32> to vector<8x128xf32>
    %41 = arith.truncf %33 : vector<8x128xf32> to vector<8x128xbf16>
    %cst_21 = arith.constant dense<0.000000e+00> : vector<8x128xf32>
    %42 = tpu.matmul %41, %3, %cst_21 {dimension_numbers = #tpu.dot_dimension_numbers<[1], [0], [0], [1], [0, 0, 1, 1], [], []>} : vector<8x128xbf16>, vector<128x128xbf16>, vector<8x128xf32> -> vector<8x128xf32>
    %43 = arith.addf %40, %42 : vector<8x128xf32>
    %44 = math.tanh %43 : vector<8x128xf32>
    %45 = arith.index_cast %c3_i32 : i32 to index
    %c0_22 = arith.constant 0 : index
    %c0_23 = arith.constant 0 : index
    %46 = vector.load %arg8[%45, %c0_22, %c0_23] : memref<8x8x128xf32, #tpu.memory_space<vmem>>, vector<1x8x128xf32>
    %47 = vector.shape_cast %46 : vector<1x8x128xf32> to vector<8x128xf32>
    %48 = vector.shape_cast %44 : vector<8x128xf32> to vector<1x8x128xf32>
    tpu.vector_store %arg8[%45, %c0_22, %c0_23], %48 {strides = array<i32>} : memref<8x8x128xf32, #tpu.memory_space<vmem>>, vector<1x8x128xf32>,
    %c4_i32 = arith.constant 4 : i32
    %49 = arith.index_cast %c4_i32 : i32 to index
    %c0_24 = arith.constant 0 : index
    %c0_25 = arith.constant 0 : index
    %50 = vector.load %arg2[%49, %c0_24, %c0_25] : memref<8x8x128xf32, #tpu.memory_space<vmem>>, vector<1x8x128xf32>
    %51 = vector.shape_cast %50 : vector<1x8x128xf32> to vector<8x128xf32>
    %52 = arith.truncf %44 : vector<8x128xf32> to vector<8x128xbf16>
    %cst_26 = arith.constant dense<0.000000e+00> : vector<8x128xf32>
    %53 = tpu.matmul %52, %3, %cst_26 {dimension_numbers = #tpu.dot_dimension_numbers<[1], [0], [0], [1], [0, 0, 1, 1], [], []>} : vector<8x128xbf16>, vector<128x128xbf16>, vector<8x128xf32> -> vector<8x128xf32>
    %54 = arith.addf %51, %53 : vector<8x128xf32>
    %55 = math.tanh %54 : vector<8x128xf32>
    %56 = arith.index_cast %c4_i32 : i32 to index
    %c0_27 = arith.constant 0 : index
    %c0_28 = arith.constant 0 : index
    %57 = vector.load %arg8[%56, %c0_27, %c0_28] : memref<8x8x128xf32, #tpu.memory_space<vmem>>, vector<1x8x128xf32>
    %58 = vector.shape_cast %57 : vector<1x8x128xf32> to vector<8x128xf32>
    %59 = vector.shape_cast %55 : vector<8x128xf32> to vector<1x8x128xf32>
    tpu.vector_store %arg8[%56, %c0_27, %c0_28], %59 {strides = array<i32>} : memref<8x8x128xf32, #tpu.memory_space<vmem>>, vector<1x8x128xf32>,
    %c5_i32 = arith.constant 5 : i32
    %60 = arith.index_cast %c5_i32 : i32 to index
    %c0_29 = arith.constant 0 : index
    %c0_30 = arith.constant 0 : index
    %61 = vector.load %arg2[%60, %c0_29, %c0_30] : memref<8x8x128xf32, #tpu.memory_space<vmem>>, vector<1x8x128xf32>
    %62 = vector.shape_cast %61 : vector<1x8x128xf32> to vector<8x128xf32>
    %63 = arith.truncf %55 : vector<8x128xf32> to vector<8x128xbf16>
    %cst_31 = arith.constant dense<0.000000e+00> : vector<8x128xf32>
    %64 = tpu.matmul %63, %3, %cst_31 {dimension_numbers = #tpu.dot_dimension_numbers<[1], [0], [0], [1], [0, 0, 1, 1], [], []>} : vector<8x128xbf16>, vector<128x128xbf16>, vector<8x128xf32> -> vector<8x128xf32>
    %65 = arith.addf %62, %64 : vector<8x128xf32>
    %66 = math.tanh %65 : vector<8x128xf32>
    %67 = arith.index_cast %c5_i32 : i32 to index
    %c0_32 = arith.constant 0 : index
    %c0_33 = arith.constant 0 : index
    %68 = vector.load %arg8[%67, %c0_32, %c0_33] : memref<8x8x128xf32, #tpu.memory_space<vmem>>, vector<1x8x128xf32>
    %69 = vector.shape_cast %68 : vector<1x8x128xf32> to vector<8x128xf32>
    %70 = vector.shape_cast %66 : vector<8x128xf32> to vector<1x8x128xf32>
    tpu.vector_store %arg8[%67, %c0_32, %c0_33], %70 {strides = array<i32>} : memref<8x8x128xf32, #tpu.memory_space<vmem>>, vector<1x8x128xf32>,
    %c6_i32 = arith.constant 6 : i32
    %71 = arith.index_cast %c6_i32 : i32 to index
    %c0_34 = arith.constant 0 : index
    %c0_35 = arith.constant 0 : index
    %72 = vector.load %arg2[%71, %c0_34, %c0_35] : memref<8x8x128xf32, #tpu.memory_space<vmem>>, vector<1x8x128xf32>
    %73 = vector.shape_cast %72 : vector<1x8x128xf32> to vector<8x128xf32>
    %74 = arith.truncf %66 : vector<8x128xf32> to vector<8x128xbf16>
    %cst_36 = arith.constant dense<0.000000e+00> : vector<8x128xf32>
    %75 = tpu.matmul %74, %3, %cst_36 {dimension_numbers = #tpu.dot_dimension_numbers<[1], [0], [0], [1], [0, 0, 1, 1], [], []>} : vector<8x128xbf16>, vector<128x128xbf16>, vector<8x128xf32> -> vector<8x128xf32>
    %76 = arith.addf %73, %75 : vector<8x128xf32>
    %77 = math.tanh %76 : vector<8x128xf32>
    %78 = arith.index_cast %c6_i32 : i32 to index
    %c0_37 = arith.constant 0 : index
    %c0_38 = arith.constant 0 : index
    %79 = vector.load %arg8[%78, %c0_37, %c0_38] : memref<8x8x128xf32, #tpu.memory_space<vmem>>, vector<1x8x128xf32>
    %80 = vector.shape_cast %79 : vector<1x8x128xf32> to vector<8x128xf32>
    %81 = vector.shape_cast %77 : vector<8x128xf32> to vector<1x8x128xf32>
    tpu.vector_store %arg8[%78, %c0_37, %c0_38], %81 {strides = array<i32>} : memref<8x8x128xf32, #tpu.memory_space<vmem>>, vector<1x8x128xf32>,
    %c7_i32 = arith.constant 7 : i32
    %82 = arith.index_cast %c7_i32 : i32 to index
    %c0_39 = arith.constant 0 : index
    %c0_40 = arith.constant 0 : index
    %83 = vector.load %arg2[%82, %c0_39, %c0_40] : memref<8x8x128xf32, #tpu.memory_space<vmem>>, vector<1x8x128xf32>
    %84 = vector.shape_cast %83 : vector<1x8x128xf32> to vector<8x128xf32>
    %85 = arith.truncf %77 : vector<8x128xf32> to vector<8x128xbf16>
    %cst_41 = arith.constant dense<0.000000e+00> : vector<8x128xf32>
    %86 = tpu.matmul %85, %3, %cst_41 {dimension_numbers = #tpu.dot_dimension_numbers<[1], [0], [0], [1], [0, 0, 1, 1], [], []>} : vector<8x128xbf16>, vector<128x128xbf16>, vector<8x128xf32> -> vector<8x128xf32>
    %87 = arith.addf %84, %86 : vector<8x128xf32>
    %88 = math.tanh %87 : vector<8x128xf32>
    %89 = arith.index_cast %c7_i32 : i32 to index
    %c0_42 = arith.constant 0 : index
    %c0_43 = arith.constant 0 : index
    %90 = vector.load %arg8[%89, %c0_42, %c0_43] : memref<8x8x128xf32, #tpu.memory_space<vmem>>, vector<1x8x128xf32>
    %91 = vector.shape_cast %90 : vector<1x8x128xf32> to vector<8x128xf32>
    %92 = vector.shape_cast %88 : vector<8x128xf32> to vector<1x8x128xf32>
    tpu.vector_store %arg8[%89, %c0_42, %c0_43], %92 {strides = array<i32>} : memref<8x8x128xf32, #tpu.memory_space<vmem>>, vector<1x8x128xf32>,
    %c8_i32 = arith.constant 8 : i32
    %c0_44 = arith.constant 0 : index
    %c0_45 = arith.constant 0 : index
    %93 = vector.load %arg7[%c0_44, %c0_45] : memref<8x128xf32, #tpu.memory_space<vmem>>, vector<8x128xf32>
    tpu.vector_store %arg7[%c0_44, %c0_45], %88 {strides = array<i32>} : memref<8x128xf32, #tpu.memory_space<vmem>>, vector<8x128xf32>,
    %c0_46 = arith.constant 0 : index
    %c0_47 = arith.constant 0 : index
    %c0_48 = arith.constant 0 : index
    %94 = vector.load %arg8[%c0_46, %c0_47, %c0_48] : memref<8x8x128xf32, #tpu.memory_space<vmem>>, vector<8x8x128xf32>
    %95 = vector.shape_cast %94 : vector<8x8x128xf32> to vector<64x128xf32>
    %96 = arith.truncf %95 : vector<64x128xf32> to vector<64x128xbf16>
    %c0_49 = arith.constant 0 : index
    %c0_50 = arith.constant 0 : index
    %97 = vector.load %arg4[%c0_49, %c0_50] : memref<128x128xbf16, #tpu.memory_space<vmem>>, vector<128x128xbf16>
    %cst_51 = arith.constant dense<0.000000e+00> : vector<64x128xf32>
    %98 = tpu.matmul %96, %97, %cst_51 {dimension_numbers = #tpu.dot_dimension_numbers<[1], [0], [0], [1], [0, 0, 1, 1], [], []>} : vector<64x128xbf16>, vector<128x128xbf16>, vector<64x128xf32> -> vector<64x128xf32>
    %c0_52 = arith.constant 0 : index
    %c0_53 = arith.constant 0 : index
    %99 = vector.load %arg5[%c0_52, %c0_53] : memref<1x128xf32, #tpu.memory_space<vmem>>, vector<1x128xf32>
    %100 = vector.broadcast %99 : vector<1x128xf32> to vector<64x128xf32>
    %101 = arith.addf %98, %100 : vector<64x128xf32>
    %102 = vector.shape_cast %101 : vector<64x128xf32> to vector<8x8x128xf32>
    %c0_54 = arith.constant 0 : index
    %c0_55 = arith.constant 0 : index
    %c0_56 = arith.constant 0 : index
    %103 = vector.load %arg6[%c0_54, %c0_55, %c0_56] : memref<8x8x128xf32, #tpu.memory_space<vmem>>, vector<8x8x128xf32>
    tpu.vector_store %arg6[%c0_54, %c0_55, %c0_56], %102 {strides = array<i32>} : memref<8x8x128xf32, #tpu.memory_space<vmem>>, vector<8x8x128xf32>,
    return
  }
  func.func @transform_0(%arg0: i32, %arg1: i32) -> (i32, i32, i32) {
    %c0_i32 = arith.constant 0 : i32
    %c0_i32_0 = arith.constant 0 : i32
    return %arg1, %arg0, %c0_i32 : i32, i32, i32
  }
  func.func @transform_1(%arg0: i32, %arg1: i32) -> (i32, i32) {
    %c0_i32 = arith.constant 0 : i32
    %c0_i32_0 = arith.constant 0 : i32
    %c0_i32_1 = arith.constant 0 : i32
    return %c0_i32, %c0_i32_0 : i32, i32
  }
  func.func @transform_2(%arg0: i32, %arg1: i32) -> (i32, i32) {
    %c0_i32 = arith.constant 0 : i32
    %c0_i32_0 = arith.constant 0 : i32
    %c0_i32_1 = arith.constant 0 : i32
    return %c0_i32, %c0_i32_0 : i32, i32
  }
  func.func @transform_3(%arg0: i32, %arg1: i32) -> (i32, i32) {
    %c0_i32 = arith.constant 0 : i32
    %c0_i32_0 = arith.constant 0 : i32
    %c0_i32_1 = arith.constant 0 : i32
    return %c0_i32, %c0_i32_0 : i32, i32
  }
  func.func @transform_4(%arg0: i32, %arg1: i32) -> (i32, i32, i32) {
    %c0_i32 = arith.constant 0 : i32
    %c0_i32_0 = arith.constant 0 : i32
    return %arg1, %arg0, %c0_i32 : i32, i32, i32
  }
}

</mosaic_0001>

<bundles_post_ra>
// kernel: rnn_ner_forward.2
= control target key start
LH: loop header
LB: loop body
LE: loop exit
PB: predicated region body
PF: predicated region fallthrough
CT: control target
= control target key end

     0   :  { %vm79_vm0 = vcmask 523264   ;;  %s292_s1 = inlined_call_operand.vmem [shape: bf16[64,128], index: 1, kind: input, shape index: {}]   ;;  %s293_s0 = inlined_call_operand.vmem [shape: bf16[50,64], index: 0, kind: input, shape index: {}]   ;;  %s294_s2 = inlined_call_operand.vmem [shape: f32[1,128], index: 2, kind: input, shape index: {}]   ;;  %s295_s3 = inlined_call_operand.vmem [shape: f32[50,128], index: 3, kind: output, shape index: {}]  }
   0x1   :  { %v212_v0 = vld [vmem:[%s292_s1] sm:$0xff]   ;;  %v213_v1 = vld [vmem:[%s292_s1 + $0x8] sm:$0xff]   ;;  %v214_v2 = vld [vmem:[%s292_s1 + $0x10] sm:$0xff]  }
   0x2   :  { %188 = vmatprep.subr.bf16.mxu0 %v212_v0  ;;  %204 = vmatprep.subr.bf16.mxu1 %v212_v0  ;;  %v216_v3 = vld [vmem:[%s293_s0] sm:$0xff]   ;;  %v217_v4 = vld [vmem:[%s293_s0 + $0x10] sm:$0xff]   ;;  %v215_v5 = vld [vmem:[%s292_s1 + $0x18] sm:$0xff]  }
   0x3   :  { %189 = vmatpush3.bf16.msra.mxu0 %v212_v0  ;;  %208 = vmatpush3.bf16.msra.mxu1 %v212_v0  ;;  %v218_v6 = vld [vmem:[%s293_s0 + $0x8] sm:$0xff]   ;;  %v219_v7 = vld [vmem:[%s293_s0 + $0x18] ss:$0 sps:$4 sm:$0x11]   ;;  %v167_v8 = vld [vmem:[%s294_s2] ss:$0 sm:$0xff] }
   0x4   :  { %190 = vmatprep.subr.bf16.mxu0 %v213_v1  ;;  %205 = vmatprep.subr.bf16.mxu1 %v213_v1 }
   0x5   :  { %196 = vmatprep.mubr.msk.bf16.mxu0 %vm79_vm0, %v216_v3  ;;  %200 = vmatprep.mubr.msk.bf16.mxu1 %vm79_vm0, %v217_v4 }
   0x7   :  { %191 = vmatpush3.bf16.msra.mxu0 %v213_v1  ;;  %209 = vmatpush3.bf16.msra.mxu1 %v213_v1 }
   0x8   :  { %192 = vmatprep.subr.bf16.mxu0 %v214_v2  ;;  %206 = vmatprep.subr.bf16.mxu1 %v214_v2 }
   0xb   :  { %193 = vmatpush3.bf16.msra.mxu0 %v214_v2  ;;  %210 = vmatpush3.bf16.msra.mxu1 %v214_v2 }
   0xc   :  { %194 = vmatprep.subr.bf16.mxu0 %v215_v5  ;;  %207 = vmatprep.subr.bf16.mxu1 %v215_v5 }
   0xf   :  { %195 = vmatpush3.bf16.msra.mxu0 %v215_v5  ;;  %211 = vmatpush3.bf16.msra.mxu1 %v215_v5 }
  0x12   :  { %197 = vmatmul.mubr.msk.bf16.vlgmr.msra.gmra.mrb[0].mxu0 %vm79_vm0, %v218_v6  ;;  %201 = vmatmul.mubr.msk.bf16.vlgmr.msra.gmra.mrb[0].mxu1 %vm79_vm0, %v219_v7 }
  0xe5   :  { %v198_v9 = vpop.f32.mrb[0].mxu0  ;;  %v202_v10 = vpop.f32.mrb[0].mxu1 }
  0xe6   :  { %v135_v11 = vadd.f32 %v198_v9, %v167_v8  ;;  %v151_v12 = vadd.f32 %v202_v10, %v167_v8  ;;  %v126_v13 = vpop.f32.mrb[1].mxu0  ;;  %v142_v14 = vpop.f32.mrb[1].mxu1 }
  0xe7   :  { %v127_v15 = vadd.f32 %v167_v8, %v126_v13  ;;  %v143_v16 = vadd.f32 %v167_v8, %v142_v14  ;;  %v199_v17 = vpop.f32.mrb[2].mxu0  ;;  %v203_v18 = vpop.f32.mrb[2].mxu1 }
  0xe8   :  { %158 = vst [vmem:[%s295_s3 + $0x10] sm:$0xff] %v135_v11  ;;  %162 = vst [vmem:[%s295_s3 + $0x30] sm:$0x3] %v151_v12  ;;  %v138_v19 = vadd.f32 %v199_v17, %v167_v8  ;;  %v129_v20 = vpop.f32.mrb[3].mxu0  ;;  %v145_v21 = vpop.f32.mrb[3].mxu1 }
  0xe9   :  { %156 = vst [vmem:[%s295_s3] sm:$0xff] %v127_v15  ;;  %160 = vst [vmem:[%s295_s3 + $0x20] sm:$0xff] %v143_v16  ;;  %v130_v22 = vadd.f32 %v167_v8, %v129_v20  ;;  %v146_v23 = vadd.f32 %v167_v8, %v145_v21 }
  0xea   :  { %159 = vst [vmem:[%s295_s3 + $0x18] sm:$0xff] %v138_v19 }
  0xeb   :  { %157 = vst [vmem:[%s295_s3 + $0x8] sm:$0xff] %v130_v22  ;;  %161 = vst [vmem:[%s295_s3 + $0x28] sm:$0xff] %v146_v23 }

// kernel: rnn_ner_forward.3
= control target key start
LH: loop header
LB: loop body
LE: loop exit
PB: predicated region body
PF: predicated region fallthrough
CT: control target
= control target key end

     0   :  { %v950_v0 = vmov 0.0   ;;  %vm951_vm0 = vmmov 0   ;;  %v952_v9 = vmov 0.0|0.0   ;;  %s1257_s1 = inlined_call_operand.vmem [shape: bf16[128,128], index: 1, kind: input, shape index: {}]   ;;  %s1258_s0 = inlined_call_operand.vmem [shape: f32[8,8,128], index: 0, kind: input, shape index: {}]   ;;  %s1259_s2 = inlined_call_operand.vmem [shape: bf16[128,128], index: 2, kind: input, shape index: {}]   ;;  %s1260_s3 = inlined_call_operand.vmem [shape: f32[1,128], index: 3, kind: input, shape index: {}]   ;;  %s1261_s4 = inlined_call_operand.vmem [shape: f32[8,8,128], index: 4, kind: output, shape index: {}]  }
   0x1   :  { %731 = vmatprep.subr.bf16.mxu1 %v950_v0  ;;  %v982_v1 = vld [vmem:[%s1257_s1] sm:$0xff]   ;;  %747 = vmatprep.mubr.msk.bf16.mxu1 %vm951_vm0, %v950_v0  ;;  %v993_v2 = vld [vmem:[%s1257_s1 + $0x8] sm:$0xff]   ;;  %v1002_v3 = vld [vmem:[%s1257_s1 + $0x10] sm:$0xff]  }
   0x2   :  { %771 = vmatprep.subr.bf16.mxu0 %v950_v0  ;;  %787 = vmatprep.mubr.msk.bf16.mxu0 %vm951_vm0, %v950_v0  ;;  %v1011_v4 = vld [vmem:[%s1257_s1 + $0x18] sm:$0xff]   ;;  %v1020_v5 = vld [vmem:[%s1257_s1 + $0x20] sm:$0xff]   ;;  %v1029_v6 = vld [vmem:[%s1257_s1 + $0x28] sm:$0xff]  }
   0x3   :  { %732 = vmatpush3.bf16.msra.mxu1 %v982_v1  ;;  %772 = vmatpush3.bf16.msra.mxu0 %v982_v1  ;;  %v1038_v7 = vld [vmem:[%s1257_s1 + $0x30] sm:$0xff]   ;;  %v1047_v8 = vld [vmem:[%s1257_s1 + $0x38] sm:$0xff]   ;;  %v40_v10 = vld [vmem:[%s1258_s0] sm:$0xff] }
   0x4   :  { %733 = vmatprep.subr.bf16.mxu1 %v950_v0  ;;  %773 = vmatprep.subr.bf16.mxu0 %v950_v0  ;;  %v631_v18 = vld [vmem:[%s1258_s0 + $0x8] sm:$0xff]  ;;  %v632_v26 = vld [vmem:[%s1258_s0 + $0x10] sm:$0xff]  ;;  %v633_v34 = vld [vmem:[%s1258_s0 + $0x18] sm:$0xff] }
   0x5   :  { %v634_v42 = vld [vmem:[%s1258_s0 + $0x20] sm:$0xff]  ;;  %v635_v51 = vld [vmem:[%s1258_s0 + $0x28] sm:$0xff]  ;;  %v928_v61 = vld [vmem:[%s1259_s2 + $0x10] sm:$0xff]  }
   0x6   :  { %v926_v50 = vld [vmem:[%s1259_s2] sm:$0xff]   ;;  %v927_v59 = vld [vmem:[%s1259_s2 + $0x8] sm:$0xff]   ;;  %v929_v62 = vld [vmem:[%s1259_s2 + $0x18] sm:$0xff]  }
   0x7   :  { %734 = vmatpush3.bf16.msra.mxu1 %v993_v2  ;;  %774 = vmatpush3.bf16.msra.mxu0 %v993_v2  ;;  %v930_v63 = vld [vmem:[%s1259_s2 + $0x20] sm:$0xff]  }
   0x8   :  { %735 = vmatprep.subr.bf16.mxu1 %v950_v0  ;;  %775 = vmatprep.subr.bf16.mxu0 %v950_v0 }
   0xb   :  { %736 = vmatpush3.bf16.msra.mxu1 %v1002_v3  ;;  %776 = vmatpush3.bf16.msra.mxu0 %v1002_v3 }
   0xc   :  { %737 = vmatprep.subr.bf16.mxu1 %v950_v0  ;;  %777 = vmatprep.subr.bf16.mxu0 %v950_v0 }
   0xf   :  { %738 = vmatpush3.bf16.msra.mxu1 %v1011_v4  ;;  %778 = vmatpush3.bf16.msra.mxu0 %v1011_v4 }
  0x10   :  { %739 = vmatprep.subr.bf16.mxu1 %v950_v0  ;;  %779 = vmatprep.subr.bf16.mxu0 %v950_v0 }
  0x13   :  { %740 = vmatpush3.bf16.msra.mxu1 %v1020_v5  ;;  %780 = vmatpush3.bf16.msra.mxu0 %v1020_v5 }
  0x14   :  { %741 = vmatprep.subr.bf16.mxu1 %v950_v0  ;;  %781 = vmatprep.subr.bf16.mxu0 %v950_v0 }
  0x17   :  { %742 = vmatpush3.bf16.msra.mxu1 %v1029_v6  ;;  %782 = vmatpush3.bf16.msra.mxu0 %v1029_v6 }
  0x18   :  { %743 = vmatprep.subr.bf16.mxu1 %v950_v0  ;;  %783 = vmatprep.subr.bf16.mxu0 %v950_v0 }
  0x1b   :  { %744 = vmatpush3.bf16.msra.mxu1 %v1038_v7  ;;  %784 = vmatpush3.bf16.msra.mxu0 %v1038_v7 }
  0x1c   :  { %745 = vmatprep.subr.bf16.mxu1 %v950_v0  ;;  %785 = vmatprep.subr.bf16.mxu0 %v950_v0 }
  0x1f   :  { %746 = vmatpush3.bf16.msra.mxu1 %v1047_v8  ;;  %786 = vmatpush3.bf16.msra.mxu0 %v1047_v8 }
  0x20   :  { %751 = vmatprep.subr.bf16.mxu1 %v950_v0  ;;  %811 = vmatprep.subr.bf16.mxu0 %v950_v0 }
  0x22   :  { %748 = vmatmul.mubr.bf16.vlgmr.msra.gmra.mrb[0].mxu1 %v952_v9 }
  0x23   :  { %752 = vmatpush3.bf16.msra.mxu1 %v982_v1  ;;  %767 = vmatprep.mubr.msk.bf16.mxu1 %vm951_vm0, %v950_v0 }
  0x24   :  { %753 = vmatprep.subr.bf16.mxu1 %v950_v0 }
  0x27   :  { %754 = vmatpush3.bf16.msra.mxu1 %v993_v2 }
  0x28   :  { %755 = vmatprep.subr.bf16.mxu1 %v950_v0 }
  0x2b   :  { %756 = vmatpush3.bf16.msra.mxu1 %v1002_v3 }
  0x2c   :  { %757 = vmatprep.subr.bf16.mxu1 %v950_v0 }
  0x2f   :  { %758 = vmatpush3.bf16.msra.mxu1 %v1011_v4 }
  0x30   :  { %759 = vmatprep.subr.bf16.mxu1 %v950_v0 }
  0x33   :  { %760 = vmatpush3.bf16.msra.mxu1 %v1020_v5 }
  0x34   :  { %761 = vmatprep.subr.bf16.mxu1 %v950_v0 }
  0x37   :  { %762 = vmatpush3.bf16.msra.mxu1 %v1029_v6 }
  0x38   :  { %763 = vmatprep.subr.bf16.mxu1 %v950_v0 }
  0x3b   :  { %764 = vmatpush3.bf16.msra.mxu1 %v1038_v7 }
  0x3c   :  { %765 = vmatprep.subr.bf16.mxu1 %v950_v0 }
  0x3f   :  { %766 = vmatpush3.bf16.msra.mxu1 %v1047_v8 }
  0x40   :  { %791 = vmatprep.subr.bf16.mxu1 %v950_v0 }
  0xf5   :  { %v124_v11 = vpop.f32.mrb[0].mxu1 }
  0xf6   :  { %v130_v12 = vadd.f32 %v124_v11, %v40_v10  ;;  %v749_v13 = vpop.f32.mrb[1].mxu1 }
  0xf7   :  { %v127_v14 = vpop.f32.mrb[2].mxu1  ;;  %v638_v13 = vld [vmem:[%s1260_s3] ss:$0 sm:$0xff] }
  0xf8   :  { %934 = vtanh.f32 %v130_v12  ;;  %v750_v15 = vpop.f32.mrb[3].mxu1 }
 0x102   :  { %v1077_v16 = vpop.eup %934 }
 0x103   :  { %v135_v17 = vpack.c.bf16 %v1077_v16, %v1077_v16 }
 0x105   :  { %768 = vmatmul.mubr.bf16.vlgmr.msra.gmra.mrb[4].mxu1 %v135_v17 }
 0x106   :  { %792 = vmatpush3.bf16.msra.mxu1 %v982_v1  ;;  %807 = vmatprep.mubr.msk.bf16.mxu1 %vm951_vm0, %v950_v0 }
 0x107   :  { %793 = vmatprep.subr.bf16.mxu1 %v950_v0 }
 0x10a   :  { %794 = vmatpush3.bf16.msra.mxu1 %v993_v2 }
 0x10b   :  { %795 = vmatprep.subr.bf16.mxu1 %v950_v0 }
 0x10e   :  { %796 = vmatpush3.bf16.msra.mxu1 %v1002_v3 }
 0x10f   :  { %797 = vmatprep.subr.bf16.mxu1 %v950_v0 }
 0x112   :  { %798 = vmatpush3.bf16.msra.mxu1 %v1011_v4 }
 0x113   :  { %799 = vmatprep.subr.bf16.mxu1 %v950_v0 }
 0x116   :  { %800 = vmatpush3.bf16.msra.mxu1 %v1020_v5 }
 0x117   :  { %801 = vmatprep.subr.bf16.mxu1 %v950_v0 }
 0x11a   :  { %802 = vmatpush3.bf16.msra.mxu1 %v1029_v6 }
 0x11b   :  { %803 = vmatprep.subr.bf16.mxu1 %v950_v0 }
 0x11e   :  { %804 = vmatpush3.bf16.msra.mxu1 %v1038_v7 }
 0x11f   :  { %805 = vmatprep.subr.bf16.mxu1 %v950_v0 }
 0x122   :  { %806 = vmatpush3.bf16.msra.mxu1 %v1047_v8 }
 0x123   :  { %831 = vmatprep.subr.bf16.mxu1 %v950_v0 }
 0x1d8   :  { %v170_v19 = vpop.f32.mrb[4].mxu1 }
 0x1d9   :  { %v176_v20 = vadd.f32 %v631_v18, %v170_v19  ;;  %v769_v21 = vpop.f32.mrb[5].mxu1 }
 0x1da   :  { %v173_v22 = vpop.f32.mrb[6].mxu1 }
 0x1db   :  { %936 = vtanh.f32 %v176_v20  ;;  %v770_v23 = vpop.f32.mrb[7].mxu1  ;;  %v637_v22 = vld [vmem:[%s1258_s0 + $0x38] sm:$0xff] }
 0x1e5   :  { %v1102_v24 = vpop.eup %936 }
 0x1e6   :  { %v182_v25 = vpack.c.bf16 %v1102_v24, %v1102_v24  ;;  %v471_v60 = vpack.c.bf16 %v1102_v24, %v1077_v16 }
 0x1e8   :  { %788 = vmatmul.mubr.bf16.vlgmr.msra.gmra.mrb[0].mxu0 %v182_v25 }
 0x1e9   :  { %812 = vmatpush3.bf16.msra.mxu0 %v982_v1  ;;  %827 = vmatprep.mubr.msk.bf16.mxu0 %vm951_vm0, %v950_v0 }
 0x1ea   :  { %813 = vmatprep.subr.bf16.mxu0 %v950_v0 }
 0x1ed   :  { %814 = vmatpush3.bf16.msra.mxu0 %v993_v2 }
 0x1ee   :  { %815 = vmatprep.subr.bf16.mxu0 %v950_v0 }
 0x1f1   :  { %816 = vmatpush3.bf16.msra.mxu0 %v1002_v3 }
 0x1f2   :  { %817 = vmatprep.subr.bf16.mxu0 %v950_v0 }
 0x1f5   :  { %818 = vmatpush3.bf16.msra.mxu0 %v1011_v4 }
 0x1f6   :  { %819 = vmatprep.subr.bf16.mxu0 %v950_v0 }
 0x1f9   :  { %820 = vmatpush3.bf16.msra.mxu0 %v1020_v5 }
 0x1fa   :  { %821 = vmatprep.subr.bf16.mxu0 %v950_v0 }
 0x1fd   :  { %822 = vmatpush3.bf16.msra.mxu0 %v1029_v6 }
 0x1fe   :  { %823 = vmatprep.subr.bf16.mxu0 %v950_v0 }
 0x201   :  { %824 = vmatpush3.bf16.msra.mxu0 %v1038_v7 }
 0x202   :  { %825 = vmatprep.subr.bf16.mxu0 %v950_v0 }
 0x205   :  { %826 = vmatpush3.bf16.msra.mxu0 %v1047_v8 }
 0x206   :  { %851 = vmatprep.subr.bf16.mxu0 %v950_v0 }
 0x2bb   :  { %v217_v27 = vpop.f32.mrb[0].mxu0 }
 0x2bc   :  { %v223_v28 = vadd.f32 %v632_v26, %v217_v27  ;;  %v789_v29 = vpop.f32.mrb[1].mxu0 }
 0x2bd   :  { %v220_v30 = vpop.f32.mrb[2].mxu0 }
 0x2be   :  { %938 = vtanh.f32 %v223_v28  ;;  %v790_v31 = vpop.f32.mrb[3].mxu0 }
 0x2c8   :  { %v1127_v32 = vpop.eup %938 }
 0x2c9   :  { %v229_v33 = vpack.c.bf16 %v1127_v32, %v1127_v32 }
 0x2cb   :  { %808 = vmatmul.mubr.bf16.vlgmr.msra.gmra.mrb[8].mxu1 %v229_v33 }
 0x2cc   :  { %832 = vmatpush3.bf16.msra.mxu1 %v982_v1  ;;  %847 = vmatprep.mubr.msk.bf16.mxu1 %vm951_vm0, %v950_v0 }
 0x2cd   :  { %833 = vmatprep.subr.bf16.mxu1 %v950_v0 }
 0x2d0   :  { %834 = vmatpush3.bf16.msra.mxu1 %v993_v2 }
 0x2d1   :  { %835 = vmatprep.subr.bf16.mxu1 %v950_v0 }
 0x2d4   :  { %836 = vmatpush3.bf16.msra.mxu1 %v1002_v3 }
 0x2d5   :  { %837 = vmatprep.subr.bf16.mxu1 %v950_v0 }
 0x2d8   :  { %838 = vmatpush3.bf16.msra.mxu1 %v1011_v4 }
 0x2d9   :  { %839 = vmatprep.subr.bf16.mxu1 %v950_v0 }
 0x2dc   :  { %840 = vmatpush3.bf16.msra.mxu1 %v1020_v5 }
 0x2dd   :  { %841 = vmatprep.subr.bf16.mxu1 %v950_v0 }
 0x2e0   :  { %842 = vmatpush3.bf16.msra.mxu1 %v1029_v6 }
 0x2e1   :  { %843 = vmatprep.subr.bf16.mxu1 %v950_v0 }
 0x2e4   :  { %844 = vmatpush3.bf16.msra.mxu1 %v1038_v7 }
 0x2e5   :  { %845 = vmatprep.subr.bf16.mxu1 %v950_v0 }
 0x2e8   :  { %846 = vmatpush3.bf16.msra.mxu1 %v1047_v8 }
 0x2e9   :  { %871 = vmatprep.subr.bf16.mxu1 %v950_v0 }
 0x39e   :  { %v264_v35 = vpop.f32.mrb[8].mxu1 }
 0x39f   :  { %v270_v36 = vadd.f32 %v633_v34, %v264_v35  ;;  %v809_v37 = vpop.f32.mrb[9].mxu1 }
 0x3a0   :  { %v267_v38 = vpop.f32.mrb[10].mxu1 }
 0x3a1   :  { %940 = vtanh.f32 %v270_v36  ;;  %v810_v39 = vpop.f32.mrb[11].mxu1 }
 0x3ab   :  { %v1152_v40 = vpop.eup %940 }
 0x3ac   :  { %v276_v41 = vpack.c.bf16 %v1152_v40, %v1152_v40 }
 0x3ae   :  { %828 = vmatmul.mubr.bf16.vlgmr.msra.gmra.mrb[4].mxu0 %v276_v41 }
 0x3af   :  { %852 = vmatpush3.bf16.msra.mxu0 %v982_v1  ;;  %867 = vmatprep.mubr.msk.bf16.mxu0 %vm951_vm0, %v950_v0 }
 0x3b0   :  { %853 = vmatprep.subr.bf16.mxu0 %v950_v0 }
 0x3b3   :  { %854 = vmatpush3.bf16.msra.mxu0 %v993_v2 }
 0x3b4   :  { %855 = vmatprep.subr.bf16.mxu0 %v950_v0 }
 0x3b7   :  { %856 = vmatpush3.bf16.msra.mxu0 %v1002_v3 }
 0x3b8   :  { %857 = vmatprep.subr.bf16.mxu0 %v950_v0 }
 0x3bb   :  { %858 = vmatpush3.bf16.msra.mxu0 %v1011_v4 }
 0x3bc   :  { %859 = vmatprep.subr.bf16.mxu0 %v950_v0 }
 0x3bf   :  { %860 = vmatpush3.bf16.msra.mxu0 %v1020_v5 }
 0x3c0   :  { %861 = vmatprep.subr.bf16.mxu0 %v950_v0 }
 0x3c3   :  { %862 = vmatpush3.bf16.msra.mxu0 %v1029_v6 }
 0x3c4   :  { %863 = vmatprep.subr.bf16.mxu0 %v950_v0 }
 0x3c7   :  { %864 = vmatpush3.bf16.msra.mxu0 %v1038_v7 }
 0x3c8   :  { %865 = vmatprep.subr.bf16.mxu0 %v950_v0 }
 0x3cb   :  { %866 = vmatpush3.bf16.msra.mxu0 %v1047_v8 }
 0x3cc   :  { %891 = vmatprep.subr.bf16.mxu0 %v926_v50 }
 0x481   :  { %v311_v43 = vpop.f32.mrb[4].mxu0 }
 0x482   :  { %v317_v44 = vadd.f32 %v634_v42, %v311_v43  ;;  %v829_v45 = vpop.f32.mrb[5].mxu0 }
 0x483   :  { %v314_v46 = vpop.f32.mrb[6].mxu0 }
 0x484   :  { %942 = vtanh.f32 %v317_v44  ;;  %v830_v47 = vpop.f32.mrb[7].mxu0 }
 0x48e   :  { %v943_v48 = vpop.eup %942 }
 0x48f   :  { %v323_v49 = vpack.c.bf16 %v943_v48, %v943_v48 }
 0x491   :  { %848 = vmatmul.mubr.bf16.vlgmr.msra.gmra.mrb[12].mxu1 %v323_v49 }
 0x492   :  { %872 = vmatpush3.bf16.msra.mxu1 %v982_v1  ;;  %887 = vmatprep.mubr.msk.bf16.mxu1 %vm951_vm0, %v950_v0  ;;  %v932_v1 = vld [vmem:[%s1259_s2 + $0x30] sm:$0xff]  }
 0x493   :  { %873 = vmatprep.subr.bf16.mxu1 %v950_v0 }
 0x496   :  { %874 = vmatpush3.bf16.msra.mxu1 %v993_v2  ;;  %v933_v2 = vld [vmem:[%s1259_s2 + $0x38] sm:$0xff]  }
 0x497   :  { %875 = vmatprep.subr.bf16.mxu1 %v950_v0 }
 0x49a   :  { %876 = vmatpush3.bf16.msra.mxu1 %v1002_v3  ;;  %v472_v3 = vpack.c.bf16 %v1152_v40, %v1127_v32 }
 0x49b   :  { %877 = vmatprep.subr.bf16.mxu1 %v950_v0 }
 0x49e   :  { %878 = vmatpush3.bf16.msra.mxu1 %v1011_v4 }
 0x49f   :  { %879 = vmatprep.subr.bf16.mxu1 %v950_v0 }
 0x4a2   :  { %880 = vmatpush3.bf16.msra.mxu1 %v1020_v5  ;;  %v636_v5 = vld [vmem:[%s1258_s0 + $0x30] sm:$0xff] }
 0x4a3   :  { %881 = vmatprep.subr.bf16.mxu1 %v950_v0 }
 0x4a6   :  { %882 = vmatpush3.bf16.msra.mxu1 %v1029_v6 }
 0x4a7   :  { %883 = vmatprep.subr.bf16.mxu1 %v950_v0 }
 0x4aa   :  { %884 = vmatpush3.bf16.msra.mxu1 %v1038_v7 }
 0x4ab   :  { %885 = vmatprep.subr.bf16.mxu1 %v950_v0  ;;  %v931_v0 = vld [vmem:[%s1259_s2 + $0x28] sm:$0xff]  }
 0x4ae   :  { %886 = vmatpush3.bf16.msra.mxu1 %v1047_v8 }
 0x564   :  { %v358_v52 = vpop.f32.mrb[12].mxu1 }
 0x565   :  { %v364_v53 = vadd.f32 %v635_v51, %v358_v52  ;;  %v849_v54 = vpop.f32.mrb[13].mxu1 }
 0x566   :  { %v361_v55 = vpop.f32.mrb[14].mxu1 }
 0x567   :  { %944 = vtanh.f32 %v364_v53  ;;  %v850_v56 = vpop.f32.mrb[15].mxu1 }
 0x571   :  { %v945_v57 = vpop.eup %944 }
 0x572   :  { %v370_v58 = vpack.c.bf16 %v945_v57, %v945_v57  ;;  %v473_v4 = vpack.c.bf16 %v945_v57, %v943_v48 }
 0x574   :  { %868 = vmatmul.mubr.bf16.vlgmr.msra.gmra.mrb[8].mxu0 %v370_v58 }
 0x575   :  { %892 = vmatpush3.bf16.msra.mxu0 %v926_v50  ;;  %907 = vmatprep.mubr.bf16.mxu0 %v471_v60 }
 0x576   :  { %893 = vmatprep.subr.bf16.mxu0 %v927_v59 }
 0x579   :  { %894 = vmatpush3.bf16.msra.mxu0 %v927_v59 }
 0x57a   :  { %895 = vmatprep.subr.bf16.mxu0 %v928_v61 }
 0x57d   :  { %896 = vmatpush3.bf16.msra.mxu0 %v928_v61 }
 0x57e   :  { %897 = vmatprep.subr.bf16.mxu0 %v929_v62 }
 0x581   :  { %898 = vmatpush3.bf16.msra.mxu0 %v929_v62 }
 0x582   :  { %899 = vmatprep.subr.bf16.mxu0 %v930_v63 }
 0x585   :  { %900 = vmatpush3.bf16.msra.mxu0 %v930_v63 }
 0x586   :  { %901 = vmatprep.subr.bf16.mxu0 %v931_v0 }
 0x589   :  { %902 = vmatpush3.bf16.msra.mxu0 %v931_v0 }
 0x58a   :  { %903 = vmatprep.subr.bf16.mxu0 %v932_v1 }
 0x58d   :  { %904 = vmatpush3.bf16.msra.mxu0 %v932_v1 }
 0x58e   :  { %905 = vmatprep.subr.bf16.mxu0 %v933_v2 }
 0x591   :  { %906 = vmatpush3.bf16.msra.mxu0 %v933_v2 }
 0x594   :  { %908 = vmatmul.mubr.bf16.vlgmr.msra.gmra.mrb[12].mxu0 %v472_v3 }
 0x595   :  { %911 = vmatprep.mubr.bf16.mxu0 %v473_v4 }
 0x647   :  { %v405_v6 = vpop.f32.mrb[8].mxu0 }
 0x648   :  { %v411_v7 = vadd.f32 %v636_v5, %v405_v6  ;;  %v869_v8 = vpop.f32.mrb[9].mxu0 }
 0x649   :  { %v408_v9 = vpop.f32.mrb[10].mxu0 }
 0x64a   :  { %946 = vtanh.f32 %v411_v7  ;;  %v870_v10 = vpop.f32.mrb[11].mxu0 }
 0x654   :  { %v947_v11 = vpop.eup %946 }
 0x655   :  { %v417_v12 = vpack.c.bf16 %v947_v11, %v947_v11 }
 0x657   :  { %888 = vmatmul.mubr.bf16.vlgmr.msra.gmra.mrb[16].mxu1 %v417_v12 }
 0x667   :  { %v909_v14 = vpop.f32.mrb[12].mxu0 }
 0x668   :  { %v589_v15 = vadd.f32 %v909_v14, %v638_v13  ;;  %v580_v16 = vpop.f32.mrb[13].mxu0 }
 0x669   :  { %v581_v17 = vadd.f32 %v638_v13, %v580_v16  ;;  %v910_v18 = vpop.f32.mrb[14].mxu0 }
 0x66a   :  { %613 = vst [vmem:[%s1261_s4 + $0x10] sm:$0xff] %v589_v15  ;;  %v592_v19 = vadd.f32 %v910_v18, %v638_v13  ;;  %v583_v20 = vpop.f32.mrb[15].mxu0 }
 0x66b   :  { %611 = vst [vmem:[%s1261_s4] sm:$0xff] %v581_v17  ;;  %v584_v21 = vadd.f32 %v638_v13, %v583_v20 }
 0x66c   :  { %614 = vst [vmem:[%s1261_s4 + $0x18] sm:$0xff] %v592_v19 }
 0x66d   :  { %612 = vst [vmem:[%s1261_s4 + $0x8] sm:$0xff] %v584_v21 }
 0x72a   :  { %v452_v23 = vpop.f32.mrb[16].mxu1 }
 0x72b   :  { %v458_v24 = vadd.f32 %v637_v22, %v452_v23  ;;  %v889_v25 = vpop.f32.mrb[17].mxu1 }
 0x72c   :  { %v455_v26 = vpop.f32.mrb[18].mxu1 }
 0x72d   :  { %948 = vtanh.f32 %v458_v24  ;;  %v890_v27 = vpop.f32.mrb[19].mxu1 }
 0x737   :  { %v949_v28 = vpop.eup %948 }
 0x738   :  { %v474_v29 = vpack.c.bf16 %v949_v28, %v947_v11 }
 0x73a   :  { %912 = vmatmul.mubr.bf16.gmra.mrb[16].mxu0 %v474_v29 }
 0x80d   :  { %v913_v30 = vpop.f32.mrb[16].mxu0 }
 0x80e   :  { %v605_v31 = vadd.f32 %v913_v30, %v638_v13  ;;  %v596_v32 = vpop.f32.mrb[17].mxu0 }
 0x80f   :  { %v597_v33 = vadd.f32 %v638_v13, %v596_v32  ;;  %v914_v34 = vpop.f32.mrb[18].mxu0 }
 0x810   :  { %617 = vst [vmem:[%s1261_s4 + $0x30] sm:$0xff] %v605_v31  ;;  %v608_v35 = vadd.f32 %v914_v34, %v638_v13  ;;  %v599_v36 = vpop.f32.mrb[19].mxu0 }
 0x811   :  { %615 = vst [vmem:[%s1261_s4 + $0x20] sm:$0xff] %v597_v33  ;;  %v600_v37 = vadd.f32 %v638_v13, %v599_v36 }
 0x812   :  { %618 = vst [vmem:[%s1261_s4 + $0x38] sm:$0xff] %v608_v35 }
 0x813   :  { %616 = vst [vmem:[%s1261_s4 + $0x28] sm:$0xff] %v600_v37 }

</bundles_post_ra>
